<compile_context>
chip_gen: v7x
topology: tpu7x:2x2x1
jax: 0.10.0
libtpu: 0.0.40
codegen_flags: <defaults>
</compile_context>

<pallas_src>
import functools

import jax
import jax.numpy as jnp
from jax.experimental import pallas as pl
from jax.experimental.pallas import tpu as pltpu


def _round_up(n: int, m: int) -> int:
    return (n + m - 1) // m * m


def generator_kernel(x_ref,
                     w1_ref, b1_ref,
                     w2_ref, b2_ref,
                     w3_ref, b3_ref,
                     w4_ref, b4_ref,
                     out_ref):
    """One batch tile: 4 x (MXU matmul in bf16, f32 accumulate, bias+ReLU in f32)."""
    cdt = w1_ref.dtype  # compute dtype for MXU operands (bf16)

    h = jnp.dot(x_ref[...].astype(cdt), w1_ref[...],
                preferred_element_type=jnp.float32) + b1_ref[...]
    h = jnp.maximum(h, 0.0)

    h = jnp.dot(h.astype(cdt), w2_ref[...],
                preferred_element_type=jnp.float32) + b2_ref[...]
    h = jnp.maximum(h, 0.0)

    h = jnp.dot(h.astype(cdt), w3_ref[...],
                preferred_element_type=jnp.float32) + b3_ref[...]
    h = jnp.maximum(h, 0.0)

    h = jnp.dot(h.astype(cdt), w4_ref[...],
                preferred_element_type=jnp.float32) + b4_ref[...]
    out_ref[...] = jnp.maximum(h, 0.0).astype(out_ref.dtype)


def pad_params(params, compute_dtype=jnp.bfloat16):
    """Zero-pad every layer's feature dims to multiples of 128 (lane-dense).

    Weights -> compute_dtype (bf16), biases stay f32.  Zero padding preserves
    the original math exactly (see header comment)."""
    padded = []
    for w, b in params:
        fi, fo = w.shape
        fip, fop = _round_up(fi, 128), _round_up(fo, 128)
        wp = jnp.pad(w.astype(compute_dtype), ((0, fip - fi), (0, fop - fo)))
        bp = jnp.pad(b.astype(jnp.float32), ((0, 0), (0, fop - fo)))
        padded.append((wp, bp))
    return padded


def generator_forward(x, padded_params, out_dim, *, block_b=256):
    """x: (B, latent) f32.  padded_params from pad_params().  Returns (B, out_dim) f32.

    block_b: batch tile; 256-512 for v5e/v6e, use ~128 on v7x (64 MiB VMEM)."""
    (w1, b1), (w2, b2), (w3, b3), (w4, b4) = padded_params
    B, L = x.shape
    Lp = w1.shape[0]
    P2p = w4.shape[1]

    # Batch tile: multiple of 8 (f32 sublane), no bigger than needed.
    tb = min(block_b, _round_up(B, 8))
    Bp = _round_up(B, tb)
    xp = jnp.pad(x, ((0, Bp - B), (0, Lp - L)))

    grid = (Bp // tb,)

    flops = 2 * Bp * (w1.shape[0] * w1.shape[1] + w2.shape[0] * w2.shape[1]
                      + w3.shape[0] * w3.shape[1] + w4.shape[0] * w4.shape[1])
    bytes_accessed = int(
        xp.size * xp.dtype.itemsize
        + sum(w.size * w.dtype.itemsize + b.size * b.dtype.itemsize
              for w, b in padded_params)
        + Bp * P2p * 4)

    out = pl.pallas_call(
        generator_kernel,
        out_shape=jax.ShapeDtypeStruct((Bp, P2p), jnp.float32),
        grid=grid,
        in_specs=[
            pl.BlockSpec((tb, Lp), lambda i: (i, 0)),        # x: batch-tiled
            pl.BlockSpec(w1.shape, lambda i: (0, 0)),        # weights/biases resident
            pl.BlockSpec(b1.shape, lambda i: (0, 0)),
            pl.BlockSpec(w2.shape, lambda i: (0, 0)),
            pl.BlockSpec(b2.shape, lambda i: (0, 0)),
            pl.BlockSpec(w3.shape, lambda i: (0, 0)),
            pl.BlockSpec(b3.shape, lambda i: (0, 0)),
            pl.BlockSpec(w4.shape, lambda i: (0, 0)),
            pl.BlockSpec(b4.shape, lambda i: (0, 0)),
        ],
        out_specs=pl.BlockSpec((tb, P2p), lambda i: (i, 0)),
        compiler_params=pltpu.CompilerParams(
            dimension_semantics=("parallel",),               # megacore / 2-TC sharding
            vmem_limit_bytes=64 * 1024 * 1024,
        ),
        cost_estimate=pl.CostEstimate(
            flops=flops, transcendentals=0, bytes_accessed=bytes_accessed),
    )(xp, w1, b1, w2, b2, w3, b3, w4, b4)

    return out[:B, :out_dim]


def init_params(key, latent_size, hidden_size, image_size):
    """Deterministic init mimicking PyTorch Linear's U(-1/sqrt(fan_in), ...)."""
    dims = [latent_size, hidden_size, 2 * hidden_size, 4 * hidden_size,
            image_size ** 2]
    params = []
    for i in range(4):
        fan_in, fan_out = dims[i], dims[i + 1]
        key, kw, kb = jax.random.split(key, 3)
        bound = 1.0 / (fan_in ** 0.5)
        w = jax.random.uniform(kw, (fan_in, fan_out), jnp.float32,
                               minval=-bound, maxval=bound)
        b = jax.random.uniform(kb, (1, fan_out), jnp.float32,
                               minval=-bound, maxval=bound)
        params.append((w, b))
    return params


def reference_forward(x, params):
    """Pure f32 reference of the original PyTorch module."""
    h = x
    for w, b in params:
        h = jnp.maximum(jnp.dot(h, w) + b, 0.0)
    return h


if __name__ == "__main__":
    # Generator(image_size=16, hidden_size=32, latent_size=8), batch of 8.
    image_size, hidden_size, latent_size = 16, 32, 8
    batch = 8

    key = jax.random.PRNGKey(0)
    key, kx = jax.random.split(key)
    x = jax.random.normal(kx, (batch, latent_size), jnp.float32)
    params = init_params(key, latent_size, hidden_size, image_size)

    padded = pad_params(params)
    out = generator_forward(x, padded, image_size ** 2)
    out = jax.block_until_ready(out)

    # f32 reference; kernel uses bf16 MXU operands, so compare with a
    # bf16-appropriate tolerance (normalized max-abs error).
    ref = reference_forward(x, params)
    assert out.shape == (batch, image_size ** 2)
    err = float(jnp.max(jnp.abs(out - ref)) / (jnp.max(jnp.abs(ref)) + 1e-6))
    assert err < 2e-2, f"normalized max error too large: {err}"

    print("KERNEL_OK")
</pallas_src>

<mosaic_0001>
module attributes {stable_mosaic.version = 11 : i64} {
  func.func @generator_kernel(%arg0: i32, %arg1: memref<8x128xf32, #tpu.memory_space<vmem>>, %arg2: memref<128x128xbf16, #tpu.memory_space<vmem>>, %arg3: memref<1x128xf32, #tpu.memory_space<vmem>>, %arg4: memref<128x128xbf16, #tpu.memory_space<vmem>>, %arg5: memref<1x128xf32, #tpu.memory_space<vmem>>, %arg6: memref<128x128xbf16, #tpu.memory_space<vmem>>, %arg7: memref<1x128xf32, #tpu.memory_space<vmem>>, %arg8: memref<128x256xbf16, #tpu.memory_space<vmem>>, %arg9: memref<1x256xf32, #tpu.memory_space<vmem>>, %arg10: memref<8x256xf32, #tpu.memory_space<vmem>>) attributes {dimension_semantics = [#tpu.dimension_semantics<parallel>], iteration_bounds = array<i64: 1>, scalar_prefetch = 0 : i64, scratch_operands = 0 : i64, tpu.core_type = #tpu.core_type<tc>, window_params = [{transform_indices = @transform_0, window_bounds = array<i64: 8, 128>}, {pipeline_mode = #tpu.pipeline_mode<synchronous>, transform_indices = @transform_1, window_bounds = array<i64: 128, 128>}, {pipeline_mode = #tpu.pipeline_mode<synchronous>, transform_indices = @transform_2, window_bounds = array<i64: 1, 128>}, {pipeline_mode = #tpu.pipeline_mode<synchronous>, transform_indices = @transform_3, window_bounds = array<i64: 128, 128>}, {pipeline_mode = #tpu.pipeline_mode<synchronous>, transform_indices = @transform_4, window_bounds = array<i64: 1, 128>}, {pipeline_mode = #tpu.pipeline_mode<synchronous>, transform_indices = @transform_5, window_bounds = array<i64: 128, 128>}, {pipeline_mode = #tpu.pipeline_mode<synchronous>, transform_indices = @transform_6, window_bounds = array<i64: 1, 128>}, {pipeline_mode = #tpu.pipeline_mode<synchronous>, transform_indices = @transform_7, window_bounds = array<i64: 128, 256>}, {pipeline_mode = #tpu.pipeline_mode<synchronous>, transform_indices = @transform_8, window_bounds = array<i64: 1, 256>}, {transform_indices = @transform_9, window_bounds = array<i64: 8, 256>}]} {
    %c0 = arith.constant 0 : index
    %c0_0 = arith.constant 0 : index
    %0 = vector.load %arg1[%c0, %c0_0] : memref<8x128xf32, #tpu.memory_space<vmem>>, vector<8x128xf32>
    %1 = arith.truncf %0 : vector<8x128xf32> to vector<8x128xbf16>
    %c0_1 = arith.constant 0 : index
    %c0_2 = arith.constant 0 : index
    %2 = vector.load %arg2[%c0_1, %c0_2] : memref<128x128xbf16, #tpu.memory_space<vmem>>, vector<128x128xbf16>
    %cst = arith.constant dense<0.000000e+00> : vector<8x128xf32>
    %3 = tpu.matmul %1, %2, %cst {dimension_numbers = #tpu.dot_dimension_numbers<[1], [0], [0], [1], [0, 0, 1, 1], [], []>} : vector<8x128xbf16>, vector<128x128xbf16>, vector<8x128xf32> -> vector<8x128xf32>
    %c0_3 = arith.constant 0 : index
    %c0_4 = arith.constant 0 : index
    %4 = vector.load %arg3[%c0_3, %c0_4] : memref<1x128xf32, #tpu.memory_space<vmem>>, vector<1x128xf32>
    %5 = vector.broadcast %4 : vector<1x128xf32> to vector<8x128xf32>
    %6 = arith.addf %3, %5 : vector<8x128xf32>
    %cst_5 = arith.constant 0.000000e+00 : f32
    %7 = vector.broadcast %cst_5 : f32 to vector<8x128xf32>
    %8 = arith.maximumf %6, %7 : vector<8x128xf32>
    %9 = arith.truncf %8 : vector<8x128xf32> to vector<8x128xbf16>
    %c0_6 = arith.constant 0 : index
    %c0_7 = arith.constant 0 : index
    %10 = vector.load %arg4[%c0_6, %c0_7] : memref<128x128xbf16, #tpu.memory_space<vmem>>, vector<128x128xbf16>
    %cst_8 = arith.constant dense<0.000000e+00> : vector<8x128xf32>
    %11 = tpu.matmul %9, %10, %cst_8 {dimension_numbers = #tpu.dot_dimension_numbers<[1], [0], [0], [1], [0, 0, 1, 1], [], []>} : vector<8x128xbf16>, vector<128x128xbf16>, vector<8x128xf32> -> vector<8x128xf32>
    %c0_9 = arith.constant 0 : index
    %c0_10 = arith.constant 0 : index
    %12 = vector.load %arg5[%c0_9, %c0_10] : memref<1x128xf32, #tpu.memory_space<vmem>>, vector<1x128xf32>
    %13 = vector.broadcast %12 : vector<1x128xf32> to vector<8x128xf32>
    %14 = arith.addf %11, %13 : vector<8x128xf32>
    %cst_11 = arith.constant 0.000000e+00 : f32
    %15 = vector.broadcast %cst_11 : f32 to vector<8x128xf32>
    %16 = arith.maximumf %14, %15 : vector<8x128xf32>
    %17 = arith.truncf %16 : vector<8x128xf32> to vector<8x128xbf16>
    %c0_12 = arith.constant 0 : index
    %c0_13 = arith.constant 0 : index
    %18 = vector.load %arg6[%c0_12, %c0_13] : memref<128x128xbf16, #tpu.memory_space<vmem>>, vector<128x128xbf16>
    %cst_14 = arith.constant dense<0.000000e+00> : vector<8x128xf32>
    %19 = tpu.matmul %17, %18, %cst_14 {dimension_numbers = #tpu.dot_dimension_numbers<[1], [0], [0], [1], [0, 0, 1, 1], [], []>} : vector<8x128xbf16>, vector<128x128xbf16>, vector<8x128xf32> -> vector<8x128xf32>
    %c0_15 = arith.constant 0 : index
    %c0_16 = arith.constant 0 : index
    %20 = vector.load %arg7[%c0_15, %c0_16] : memref<1x128xf32, #tpu.memory_space<vmem>>, vector<1x128xf32>
    %21 = vector.broadcast %20 : vector<1x128xf32> to vector<8x128xf32>
    %22 = arith.addf %19, %21 : vector<8x128xf32>
    %cst_17 = arith.constant 0.000000e+00 : f32
    %23 = vector.broadcast %cst_17 : f32 to vector<8x128xf32>
    %24 = arith.maximumf %22, %23 : vector<8x128xf32>
    %25 = arith.truncf %24 : vector<8x128xf32> to vector<8x128xbf16>
    %c0_18 = arith.constant 0 : index
    %c0_19 = arith.constant 0 : index
    %26 = vector.load %arg8[%c0_18, %c0_19] : memref<128x256xbf16, #tpu.memory_space<vmem>>, vector<128x256xbf16>
    %cst_20 = arith.constant dense<0.000000e+00> : vector<8x256xf32>
    %27 = tpu.matmul %25, %26, %cst_20 {dimension_numbers = #tpu.dot_dimension_numbers<[1], [0], [0], [1], [0, 0, 1, 1], [], []>} : vector<8x128xbf16>, vector<128x256xbf16>, vector<8x256xf32> -> vector<8x256xf32>
    %c0_21 = arith.constant 0 : index
    %c0_22 = arith.constant 0 : index
    %28 = vector.load %arg9[%c0_21, %c0_22] : memref<1x256xf32, #tpu.memory_space<vmem>>, vector<1x256xf32>
    %29 = vector.broadcast %28 : vector<1x256xf32> to vector<8x256xf32>
    %30 = arith.addf %27, %29 : vector<8x256xf32>
    %cst_23 = arith.constant 0.000000e+00 : f32
    %31 = vector.broadcast %cst_23 : f32 to vector<8x256xf32>
    %32 = arith.maximumf %30, %31 : vector<8x256xf32>
    %c0_24 = arith.constant 0 : index
    %c0_25 = arith.constant 0 : index
    %33 = vector.load %arg10[%c0_24, %c0_25] : memref<8x256xf32, #tpu.memory_space<vmem>>, vector<8x256xf32>
    tpu.vector_store %arg10[%c0_24, %c0_25], %32 {strides = array<i32>} : memref<8x256xf32, #tpu.memory_space<vmem>>, vector<8x256xf32>,
    return
  }
  func.func @transform_0(%arg0: i32) -> (i32, i32) {
    %c0_i32 = arith.constant 0 : i32
    %c0_i32_0 = arith.constant 0 : i32
    return %arg0, %c0_i32 : i32, i32
  }
  func.func @transform_1(%arg0: i32) -> (i32, i32) {
    %c0_i32 = arith.constant 0 : i32
    %c0_i32_0 = arith.constant 0 : i32
    %c0_i32_1 = arith.constant 0 : i32
    return %c0_i32, %c0_i32_0 : i32, i32
  }
  func.func @transform_2(%arg0: i32) -> (i32, i32) {
    %c0_i32 = arith.constant 0 : i32
    %c0_i32_0 = arith.constant 0 : i32
    %c0_i32_1 = arith.constant 0 : i32
    return %c0_i32, %c0_i32_0 : i32, i32
  }
  func.func @transform_3(%arg0: i32) -> (i32, i32) {
    %c0_i32 = arith.constant 0 : i32
    %c0_i32_0 = arith.constant 0 : i32
    %c0_i32_1 = arith.constant 0 : i32
    return %c0_i32, %c0_i32_0 : i32, i32
  }
  func.func @transform_4(%arg0: i32) -> (i32, i32) {
    %c0_i32 = arith.constant 0 : i32
    %c0_i32_0 = arith.constant 0 : i32
    %c0_i32_1 = arith.constant 0 : i32
    return %c0_i32, %c0_i32_0 : i32, i32
  }
  func.func @transform_5(%arg0: i32) -> (i32, i32) {
    %c0_i32 = arith.constant 0 : i32
    %c0_i32_0 = arith.constant 0 : i32
    %c0_i32_1 = arith.constant 0 : i32
    return %c0_i32, %c0_i32_0 : i32, i32
  }
  func.func @transform_6(%arg0: i32) -> (i32, i32) {
    %c0_i32 = arith.constant 0 : i32
    %c0_i32_0 = arith.constant 0 : i32
    %c0_i32_1 = arith.constant 0 : i32
    return %c0_i32, %c0_i32_0 : i32, i32
  }
  func.func @transform_7(%arg0: i32) -> (i32, i32) {
    %c0_i32 = arith.constant 0 : i32
    %c0_i32_0 = arith.constant 0 : i32
    %c0_i32_1 = arith.constant 0 : i32
    return %c0_i32, %c0_i32_0 : i32, i32
  }
  func.func @transform_8(%arg0: i32) -> (i32, i32) {
    %c0_i32 = arith.constant 0 : i32
    %c0_i32_0 = arith.constant 0 : i32
    %c0_i32_1 = arith.constant 0 : i32
    return %c0_i32, %c0_i32_0 : i32, i32
  }
  func.func @transform_9(%arg0: i32) -> (i32, i32) {
    %c0_i32 = arith.constant 0 : i32
    %c0_i32_0 = arith.constant 0 : i32
    return %arg0, %c0_i32 : i32, i32
  }
}

</mosaic_0001>

<bundles_post_ra>
// kernel: tpu_custom_call.1
= control target key start
LH: loop header
LB: loop body
LE: loop exit
PB: predicated region body
PF: predicated region fallthrough
CT: control target
= control target key end

     0   :  { %14 = vsyncpa [#allocation3], 0  ;;  %s1312_s0 = inlined_call_operand.hbm [shape: f32[8,128], index: 0, kind: input, shape index: {}]   ;;  %s1313_s1 = inlined_call_operand.hbm [shape: bf16[128,128], index: 1, kind: input, shape index: {}]   ;;  %s1314_s2 = inlined_call_operand.hbm [shape: f32[1,128], index: 2, kind: input, shape index: {}]   ;;  %s1315_s3 = inlined_call_operand.hbm [shape: bf16[128,128], index: 3, kind: input, shape index: {}]   ;;  %s1316_s4 = inlined_call_operand.hbm [shape: f32[1,128], index: 4, kind: input, shape index: {}]   ;;  %s1317_s5 = inlined_call_operand.hbm [shape: bf16[128,128], index: 5, kind: input, shape index: {}]   ;;  %s1318_s6 = inlined_call_operand.hbm [shape: f32[1,128], index: 6, kind: input, shape index: {}]   ;;  %s1319_s7 = inlined_call_operand.hbm [shape: bf16[128,256], index: 7, kind: input, shape index: {}]   ;;  %s1320_s8 = inlined_call_operand.hbm [shape: f32[1,256], index: 8, kind: input, shape index: {}]   ;;  %s1321_s9 = inlined_call_operand.hbm [shape: f32[8,256], index: 9, kind: output, shape index: {}]  }
   0x1   :  { %15 = vsyncpa [#allocation6], 0 }
   0x2   :  { %16 = vsyncpa [#allocation9], 0 }
   0x3   :  { %17 = vsyncpa [#allocation12], 0 }
   0x4   :  { %18 = vsyncpa [#allocation15], 0 }
   0x5   :  { %19 = vsyncpa [#allocation4], 0  ;;  %s1086_s30 = smov [#allocation5]   ;;  %s854_s13 = scalar_lea.hbm %s1313_s1, 1024 }
   0x6   :  { %s35_s10 = sshll.u32 %s1086_s30, 4  ;;  %p855_p0 = scmp.ne.s32.totalorder %s1313_s1, %s854_s13  ;;  %s36_s10 = int_to_ptr.vmem [resolvable:$true] %s35_s10 }
   0x7   :  { %p858_p1 = scmp.lt.u32.totalorder %s854_s13, %s1313_s1 }
   0x9   :  { %p860_p2 = pnand %p858_p1, %p855_p0 }
   0xb   :  { %863 = shalt.err (!%p860_p2)
}
   0xc   :  { %s864_s18 = scalar_lea.vmem %s36_s10, 1024  ;;  %p869_p4 = scmp.lt.s32.totalorder %s36_s10, %s36_s10 }
   0xd   :  { %p865_p3 = scmp.ne.s32.totalorder %s36_s10, %s864_s18  ;;  %p870_p5 = scmp.lt.s32.totalorder %s864_s18, %s864_s18 }
   0xf   :  { %p871_p6 = por %p870_p5, %p869_p4 }
  0x11   :  { %p872_p7 = pnand %p871_p6, %p865_p3 }
  0x13   :  { %875 = shalt.err (!%p872_p7)
}
  0x14   :  { %s1087_s19 = smov 64   ;;  %s1088_s20 = smov 4  }
  0x15   :  { %41 = dma.hbm_to_vmem [thread:$0]  %s1313_s1, 1024, %s36_s10, [#allocation6], %s1087_s19, %s1087_s19, %s1088_s20  }
  0x16   :  { %s1089_s23 = smov [#allocation8]   ;;  %s1090_s25 = smov [#allocation11]  }
  0x17   :  { %s57_s24 = sshll.u32 %s1089_s23, 4  ;;  %s79_s26 = sshll.u32 %s1090_s25, 4  ;;  %s58_s24 = int_to_ptr.vmem [resolvable:$true] %s57_s24  ;;  %s80_s26 = int_to_ptr.vmem [resolvable:$true] %s79_s26 }
  0x18   :  { %s876_s29 = scalar_lea.hbm %s1315_s3, 1024 }
  0x19   :  { %p877_p8 = scmp.ne.s32.totalorder %s1315_s3, %s876_s29  ;;  %p880_p9 = scmp.lt.u32.totalorder %s876_s29, %s1315_s3 }
  0x1b   :  { %p882_p10 = pnand %p880_p9, %p877_p8 }
  0x1d   :  { %885 = shalt.err (!%p882_p10)
}
  0x1e   :  { %s886_s1 = scalar_lea.vmem %s58_s24, 1024  ;;  %p891_p12 = scmp.lt.s32.totalorder %s58_s24, %s58_s24 }
  0x1f   :  { %p887_p11 = scmp.ne.s32.totalorder %s58_s24, %s886_s1  ;;  %p892_p13 = scmp.lt.s32.totalorder %s886_s1, %s886_s1 }
  0x21   :  { %p893_p0 = por %p892_p13, %p891_p12 }
  0x23   :  { %p894_p1 = pnand %p893_p0, %p887_p11 }
  0x25   :  { %897 = shalt.err (!%p894_p1)
}
  0x26   :  { %63 = dma.hbm_to_vmem [thread:$0]  %s1315_s3, 1024, %s58_s24, [#allocation9], %s1087_s19, %s1087_s19, %s1088_s20  }
  0x27   :  { %s898_s17 = scalar_lea.hbm %s1317_s5, 1024 }
  0x28   :  { %p899_p2 = scmp.ne.s32.totalorder %s1317_s5, %s898_s17  ;;  %p902_p3 = scmp.lt.u32.totalorder %s898_s17, %s1317_s5 }
  0x2a   :  { %p904_p4 = pnand %p902_p3, %p899_p2 }
  0x2c   :  { %907 = shalt.err (!%p904_p4)
}
  0x2d   :  { %s908_s25 = scalar_lea.vmem %s80_s26, 1024  ;;  %p913_p6 = scmp.lt.s32.totalorder %s80_s26, %s80_s26 }
  0x2e   :  { %p909_p5 = scmp.ne.s32.totalorder %s80_s26, %s908_s25  ;;  %p914_p7 = scmp.lt.s32.totalorder %s908_s25, %s908_s25 }
  0x30   :  { %p915_p8 = por %p914_p7, %p913_p6 }
  0x32   :  { %p916_p9 = pnand %p915_p8, %p909_p5 }
  0x34   :  { %919 = shalt.err (!%p916_p9)
}
  0x35   :  { %85 = dma.hbm_to_vmem [thread:$0]  %s1317_s5, 1024, %s80_s26, [#allocation12], %s1087_s19, %s1087_s19, %s1088_s20  }
  0x36   :  { %s1091_s27 = smov [#allocation14]   ;;  %s920_s11 = scalar_lea.hbm %s1319_s7, 2048 }
  0x37   :  { %s101_s28 = sshll.u32 %s1091_s27, 4  ;;  %p921_p10 = scmp.ne.s32.totalorder %s1319_s7, %s920_s11  ;;  %s102_s28 = int_to_ptr.vmem [resolvable:$true] %s101_s28 }
  0x38   :  { %p924_p11 = scmp.lt.u32.totalorder %s920_s11, %s1319_s7 }
  0x3a   :  { %p926_p12 = pnand %p924_p11, %p921_p10 }
  0x3c   :  { %929 = shalt.err (!%p926_p12)
}
  0x3d   :  { %s930_s14 = scalar_lea.vmem %s102_s28, 2048  ;;  %p935_p0 = scmp.lt.s32.totalorder %s102_s28, %s102_s28 }
  0x3e   :  { %p931_p13 = scmp.ne.s32.totalorder %s102_s28, %s930_s14  ;;  %p936_p1 = scmp.lt.s32.totalorder %s930_s14, %s930_s14 }
  0x40   :  { %p937_p2 = por %p936_p1, %p935_p0 }
  0x42   :  { %p938_p3 = pnand %p937_p2, %p931_p13 }
  0x44   :  { %941 = shalt.err (!%p938_p3)
}
  0x45   :  { %s1092_s5 = smov 128   ;;  %s1093_s19 = smov 8  }
  0x46   :  { %107 = dma.hbm_to_vmem [thread:$0]  %s1319_s7, 2048, %s102_s28, [#allocation15], %s1092_s5, %s1092_s5, %s1093_s19  }
  0x47   :  { %s1094_s15 = smov [#allocation2]   ;;  %s1095_s17 = smov [#allocation7]  }
  0x48   :  { %s26_s16 = sshll.u32 %s1094_s15, 4  ;;  %s48_s18 = sshll.u32 %s1095_s17, 4  ;;  %s27_s16 = int_to_ptr.vmem [resolvable:$true] %s26_s16  ;;  %s49_s18 = int_to_ptr.vmem [resolvable:$true] %s48_s18 }
  0x49   :  { %s942_s23 = scalar_lea.hbm %s1312_s0, 128 }
  0x4a   :  { %p943_p4 = scmp.ne.s32.totalorder %s1312_s0, %s942_s23  ;;  %p946_p5 = scmp.lt.u32.totalorder %s942_s23, %s1312_s0 }
  0x4c   :  { %p948_p6 = pnand %p946_p5, %p943_p4 }
  0x4e   :  { %951 = shalt.err (!%p948_p6)
}
  0x4f   :  { %s952_s7 = scalar_lea.vmem %s27_s16, 128  ;;  %p957_p8 = scmp.lt.s32.totalorder %s27_s16, %s27_s16 }
  0x50   :  { %p953_p7 = scmp.ne.s32.totalorder %s27_s16, %s952_s7  ;;  %p958_p9 = scmp.lt.s32.totalorder %s952_s7, %s952_s7 }
  0x52   :  { %p959_p10 = por %p958_p9, %p957_p8 }
  0x54   :  { %p960_p11 = pnand %p959_p10, %p953_p7 }
  0x56   :  { %963 = shalt.err (!%p960_p11)
}
  0x57   :  { %29 = dma.hbm_to_vmem [thread:$0]  %s1312_s0, 128, %s27_s16, [#allocation3]  }
  0x58   :  { %s964_s12 = scalar_lea.hbm %s1314_s2, 16 }
  0x59   :  { %p965_p12 = scmp.ne.s32.totalorder %s1314_s2, %s964_s12  ;;  %p968_p13 = scmp.lt.u32.totalorder %s964_s12, %s1314_s2 }
  0x5b   :  { %p970_p0 = pnand %p968_p13, %p965_p12 }
  0x5d   :  { %973 = shalt.err (!%p970_p0)
}
  0x5e   :  { %s974_s5 = scalar_lea.vmem %s49_s18, 16  ;;  %s978_s19 = scalar_lea.vmem %s49_s18, 32 }
  0x5f   :  { %p975_p1 = scmp.ne.s32.totalorder %s49_s18, %s974_s5  ;;  %p979_p2 = scmp.lt.s32.totalorder %s49_s18, %s49_s18 }
  0x60   :  { %p980_p3 = scmp.lt.s32.totalorder %s978_s19, %s974_s5 }
  0x62   :  { %p981_p4 = por %p980_p3, %p979_p2 }
  0x64   :  { %p982_p5 = pnand %p981_p4, %p975_p1 }
  0x66   :  { %985 = shalt.err (!%p982_p5)
}
  0x67   :  { %51 = dma.hbm_to_vmem [thread:$0]  %s1314_s2, 16, %s49_s18, [#allocation6]  }
  0x68   :  { %s1096_s26 = smov [#allocation10]   ;;  %s1097_s16 = smov [#allocation13]  }
  0x69   :  { %s70_s15 = sshll.u32 %s1096_s26, 4  ;;  %s92_s17 = sshll.u32 %s1097_s16, 4  ;;  %s71_s15 = int_to_ptr.vmem [resolvable:$true] %s70_s15  ;;  %s93_s17 = int_to_ptr.vmem [resolvable:$true] %s92_s17 }
  0x6a   :  { %s986_s23 = scalar_lea.hbm %s1316_s4, 16 }
  0x6b   :  { %p987_p6 = scmp.ne.s32.totalorder %s1316_s4, %s986_s23  ;;  %p990_p7 = scmp.lt.u32.totalorder %s986_s23, %s1316_s4 }
  0x6d   :  { %p992_p8 = pnand %p990_p7, %p987_p6 }
  0x6f   :  { %995 = shalt.err (!%p992_p8)
}
  0x70   :  { %s996_s2 = scalar_lea.vmem %s71_s15, 16  ;;  %s1000_s18 = scalar_lea.vmem %s71_s15, 32 }
  0x71   :  { %p997_p9 = scmp.ne.s32.totalorder %s71_s15, %s996_s2  ;;  %p1001_p10 = scmp.lt.s32.totalorder %s71_s15, %s71_s15 }
  0x72   :  { %p1002_p11 = scmp.lt.s32.totalorder %s1000_s18, %s996_s2 }
  0x74   :  { %p1003_p12 = por %p1002_p11, %p1001_p10 }
  0x76   :  { %p1004_p13 = pnand %p1003_p12, %p997_p9 }
  0x78   :  { %1007 = shalt.err (!%p1004_p13)
}
  0x79   :  { %73 = dma.hbm_to_vmem [thread:$0]  %s1316_s4, 16, %s71_s15, [#allocation9]  }
  0x7a   :  { %s1008_s11 = scalar_lea.hbm %s1318_s6, 16 }
  0x7b   :  { %p1009_p0 = scmp.ne.s32.totalorder %s1318_s6, %s1008_s11  ;;  %p1012_p1 = scmp.lt.u32.totalorder %s1008_s11, %s1318_s6 }
  0x7d   :  { %p1014_p2 = pnand %p1012_p1, %p1009_p0 }
  0x7f   :  { %1017 = shalt.err (!%p1014_p2)
}
  0x80   :  { %s1018_s14 = scalar_lea.vmem %s93_s17, 16  ;;  %s1022_s5 = scalar_lea.vmem %s93_s17, 32 }
  0x81   :  { %p1019_p3 = scmp.ne.s32.totalorder %s93_s17, %s1018_s14  ;;  %p1023_p4 = scmp.lt.s32.totalorder %s93_s17, %s93_s17 }
  0x82   :  { %p1024_p5 = scmp.lt.s32.totalorder %s1022_s5, %s1018_s14 }
  0x84   :  { %p1025_p6 = por %p1024_p5, %p1023_p4 }
  0x86   :  { %p1026_p7 = pnand %p1025_p6, %p1019_p3 }
  0x88   :  { %1029 = shalt.err (!%p1026_p7)
}
  0x89   :  { %95 = dma.hbm_to_vmem [thread:$0]  %s1318_s6, 16, %s93_s17, [#allocation12]  }
  0x8a   :  { %s1098_s0 = smov [#allocation16]   ;;  %s1030_s16 = scalar_lea.hbm %s1320_s8, 32 }
  0x8b   :  { %s114_s20 = sshll.u32 %s1098_s0, 4  ;;  %p1031_p8 = scmp.ne.s32.totalorder %s1320_s8, %s1030_s16  ;;  %s115_s20 = int_to_ptr.vmem [resolvable:$true] %s114_s20 }
  0x8c   :  { %p1034_p9 = scmp.lt.u32.totalorder %s1030_s16, %s1320_s8 }
  0x8e   :  { %p1036_p10 = pnand %p1034_p9, %p1031_p8 }
  0x90   :  { %1039 = shalt.err (!%p1036_p10)
}
  0x91   :  { %s1040_s3 = scalar_lea.vmem %s115_s20, 32  ;;  %p1045_p12 = scmp.lt.s32.totalorder %s115_s20, %s115_s20 }
  0x92   :  { %p1041_p11 = scmp.ne.s32.totalorder %s115_s20, %s1040_s3  ;;  %p1046_p13 = scmp.lt.s32.totalorder %s1040_s3, %s1040_s3 }
  0x94   :  { %p1047_p0 = por %p1046_p13, %p1045_p12 }
  0x96   :  { %p1048_p1 = pnand %p1047_p0, %p1041_p11 }
  0x98   :  { %1051 = shalt.err (!%p1048_p1)
}
  0x99   :  { %117 = dma.hbm_to_vmem [thread:$0]  %s1320_s8, 32, %s115_s20, [#allocation15]  }
  0x9a   :  { %1074 = dma.done.wait [#allocation3], 128  }
  0x9b   :  { %1075 = vsyncadd [#allocation3], 4294967168 }
  0x9c   :  { %1076 = dma.done.wait [#allocation6], 1040  }
  0x9d   :  { %1077 = vsyncadd [#allocation6], 4294966256 }
  0x9e   :  { %1078 = dma.done.wait [#allocation9], 1040  }
  0x9f   :  { %1079 = vsyncadd [#allocation9], 4294966256 }
  0xa0   :  { %1080 = dma.done.wait [#allocation12], 1040  }
  0xa1   :  { %1081 = vsyncadd [#allocation12], 4294966256 }
  0xa2   :  { %1082 = dma.done.wait [#allocation15], 2080  }
  0xa3   :  { %1083 = vsyncadd [#allocation15], 4294965216  ;;  %v1099_v0 = vmov 0.0   ;;  %vm1100_vm0 = vmmov 0   ;;  %v806_v1 = vld [vmem:[#allocation5] sm:$0xff]   ;;  %v807_v2 = vld [vmem:[#allocation5 + $0x8] sm:$0xff]  }
  0xa4   :  { %729 = vmatprep.subr.bf16.mxu0 %v1099_v0  ;;  %745 = vmatprep.mubr.msk.bf16.mxu0 %vm1100_vm0, %v1099_v0  ;;  %v808_v3 = vld [vmem:[#allocation5 + $0x10] sm:$0xff]   ;;  %v814_v4 = vld [vmem:[#allocation8] sm:$0xff]   ;;  %v809_v5 = vld [vmem:[#allocation5 + $0x18] sm:$0xff]   ;;  %v1101_v59 = vmov 0   ;;  %s1102_s8 = smov [#allocation17]  }
  0xa5   :  { %749 = vmatprep.subr.bf16.mxu1 %v1099_v0  ;;  %765 = vmatprep.mubr.msk.bf16.mxu1 %vm1100_vm0, %v1099_v0  ;;  %v815_v6 = vld [vmem:[#allocation8 + $0x8] sm:$0xff]   ;;  %v810_v7 = vld [vmem:[#allocation5 + $0x20] sm:$0xff]   ;;  %v816_v8 = vld [vmem:[#allocation8 + $0x10] sm:$0xff]   ;;  %s646_s24 = sshll.u32 %s1102_s8, 4  ;;  %s647_s24 = int_to_ptr.vmem [resolvable:$true] %s646_s24 }
  0xa6   :  { %730 = vmatpush3.bf16.msra.mxu0 %v806_v1  ;;  %750 = vmatpush3.bf16.msra.mxu1 %v814_v4  ;;  %v811_v9 = vld [vmem:[#allocation5 + $0x28] sm:$0xff]   ;;  %v817_v10 = vld [vmem:[#allocation8 + $0x18] sm:$0xff]   ;;  %v812_v11 = vld [vmem:[#allocation5 + $0x30] sm:$0xff]   ;;  %v505_v4 = vlaneseq  ;;  %s1052_s27 = scalar_lea.vmem %s647_s24, 256  ;;  %p1057_p3 = scmp.lt.s32.totalorder %s647_s24, %s647_s24 }
  0xa7   :  { %731 = vmatprep.subr.bf16.mxu0 %v1099_v0  ;;  %751 = vmatprep.subr.bf16.mxu1 %v1099_v0  ;;  %v818_v12 = vld [vmem:[#allocation8 + $0x20] sm:$0xff]   ;;  %v813_v13 = vld [vmem:[#allocation5 + $0x38] sm:$0xff]   ;;  %v819_v15 = vld [vmem:[#allocation8 + $0x28] sm:$0xff]   ;;  %p1053_p2 = scmp.ne.s32.totalorder %s647_s24, %s1052_s27  ;;  %p1058_p4 = scmp.lt.s32.totalorder %s1052_s27, %s1052_s27 }
  0xa8   :  { %v146_v14 = vld [vmem:[#allocation2] sm:$0xff]  ;;  %v822_v19 = vld [vmem:[#allocation11] sm:$0xff]   ;;  %v823_v20 = vld [vmem:[#allocation11 + $0x8] sm:$0xff]  }
  0xa9   :  { %v147_v16 = vpack.c.bf16 %v146_v14, %v146_v14  ;;  %v820_v17 = vld [vmem:[#allocation8 + $0x30] sm:$0xff]   ;;  %v821_v18 = vld [vmem:[#allocation8 + $0x38] sm:$0xff]   ;;  %v826_v23 = vld [vmem:[#allocation11 + $0x20] sm:$0xff]   ;;  %p1059_p5 = por %p1058_p4, %p1057_p3 }
  0xaa   :  { %732 = vmatpush3.bf16.msra.mxu0 %v807_v2  ;;  %752 = vmatpush3.bf16.msra.mxu1 %v815_v6  ;;  %v824_v21 = vld [vmem:[#allocation11 + $0x10] sm:$0xff]   ;;  %v825_v22 = vld [vmem:[#allocation11 + $0x18] sm:$0xff]   ;;  %v827_v24 = vld [vmem:[#allocation11 + $0x28] sm:$0xff]  }
  0xab   :  { %733 = vmatprep.subr.bf16.mxu0 %v1099_v0  ;;  %753 = vmatprep.subr.bf16.mxu1 %v1099_v0  ;;  %v659_v25 = vld [vmem:[#allocation7] ss:$0 sm:$0xff]  ;;  %v828_v33 = vld [vmem:[#allocation11 + $0x30] sm:$0xff]   ;;  %v830_v35 = vld [vmem:[#allocation14] ss:$8 sps:$4 sm:$0xff]   ;;  %p1060_p6 = pnand %p1059_p5, %p1053_p2 }
  0xac   :  { %v829_v34 = vld [vmem:[#allocation11 + $0x38] sm:$0xff]   ;;  %v832_v36 = vld [vmem:[#allocation14 + $0x4] ss:$8 sps:$4 sm:$0xff]   ;;  %v836_v40 = vld [vmem:[#allocation14 + $0x20] ss:$8 sps:$4 sm:$0xff]  }
  0xad   :  { %v835_v37 = vld [vmem:[#allocation14 + $0x14] ss:$8 sps:$4 sm:$0xff]   ;;  %v833_v38 = vld [vmem:[#allocation14 + $0x10] ss:$8 sps:$4 sm:$0xff]   ;;  %v838_v39 = vld [vmem:[#allocation14 + $0x24] ss:$8 sps:$4 sm:$0xff]  }
  0xae   :  { %734 = vmatpush3.bf16.msra.mxu0 %v808_v3  ;;  %754 = vmatpush3.bf16.msra.mxu1 %v816_v8  ;;  %v841_v41 = vld [vmem:[#allocation14 + $0x34] ss:$8 sps:$4 sm:$0xff]   ;;  %v839_v42 = vld [vmem:[#allocation14 + $0x30] ss:$8 sps:$4 sm:$0xff]   ;;  %v844_v43 = vld [vmem:[#allocation14 + $0x44] ss:$8 sps:$4 sm:$0xff]  }
  0xaf   :  { %735 = vmatprep.subr.bf16.mxu0 %v1099_v0  ;;  %755 = vmatprep.subr.bf16.mxu1 %v1099_v0  ;;  %v842_v44 = vld [vmem:[#allocation14 + $0x40] ss:$8 sps:$4 sm:$0xff]   ;;  %v847_v45 = vld [vmem:[#allocation14 + $0x54] ss:$8 sps:$4 sm:$0xff]   ;;  %v845_v46 = vld [vmem:[#allocation14 + $0x50] ss:$8 sps:$4 sm:$0xff]  }
  0xb0   :  { %v850_v47 = vld [vmem:[#allocation14 + $0x64] ss:$8 sps:$4 sm:$0xff]   ;;  %v848_v48 = vld [vmem:[#allocation14 + $0x60] ss:$8 sps:$4 sm:$0xff]   ;;  %v668_v49 = vld [vmem:[#allocation10] ss:$0 sm:$0xff] }
  0xb1   :  { %v853_v57 = vld [vmem:[#allocation14 + $0x74] ss:$8 sps:$4 sm:$0xff]   ;;  %v851_v58 = vld [vmem:[#allocation14 + $0x70] ss:$8 sps:$4 sm:$0xff]  }
  0xb2   :  { %736 = vmatpush3.bf16.msra.mxu0 %v809_v5  ;;  %756 = vmatpush3.bf16.msra.mxu1 %v817_v10  ;;  %v677_v60 = vld [vmem:[#allocation13] ss:$0 sm:$0xff]  ;;  %v506_v5 = vshrl.u32 %v505_v4, 7 }
  0xb3   :  { %737 = vmatprep.subr.bf16.mxu0 %v1099_v0  ;;  %757 = vmatprep.subr.bf16.mxu1 %v1099_v0 }
  0xb4   :  { %v507_v6 = vsub.s32 0, %v506_v5  ;;  %v511_v8 = vsub.s32 1, %v506_v5 }
  0xb6   :  { %738 = vmatpush3.bf16.msra.mxu0 %v810_v7  ;;  %758 = vmatpush3.bf16.msra.mxu1 %v818_v12  ;;  %v503_v7 = vld [vmem:[#allocation16] sm:$0x3] }
  0xb7   :  { %739 = vmatprep.subr.bf16.mxu0 %v1099_v0  ;;  %759 = vmatprep.subr.bf16.mxu1 %v1099_v0  ;;  %v512_v10 = vrot.slane %v503_v7, %v511_v8 }
  0xba   :  { %740 = vmatpush3.bf16.msra.mxu0 %v811_v9  ;;  %760 = vmatpush3.bf16.msra.mxu1 %v819_v15  ;;  %v508_v9 = vrot.slane %v503_v7, %v507_v6 }
  0xbb   :  { %741 = vmatprep.subr.bf16.mxu0 %v1099_v0  ;;  %761 = vmatprep.subr.bf16.mxu1 %v1099_v0 }
  0xbe   :  { %742 = vmatpush3.bf16.msra.mxu0 %v812_v11  ;;  %762 = vmatpush3.bf16.msra.mxu1 %v820_v17 }
  0xbf   :  { %743 = vmatprep.subr.bf16.mxu0 %v1099_v0  ;;  %763 = vmatprep.subr.bf16.mxu1 %v1099_v0 }
  0xc2   :  { %744 = vmatpush3.bf16.msra.mxu0 %v813_v13  ;;  %764 = vmatpush3.bf16.msra.mxu1 %v821_v18 }
  0xc3   :  { %769 = vmatprep.subr.bf16.mxu0 %v1099_v0  ;;  %595 = vmatprep.subr.bf16.mxu1 %v832_v36 }
  0xc5   :  { %746 = vmatmul.mubr.bf16.vlgmr.msra.gmra.mrb[0].mxu0 %v147_v16 }
  0xc6   :  { %785 = vmatprep.mubr.msk.bf16.mxu0 %vm1100_vm0, %v1099_v0  ;;  %770 = vmatpush3.bf16.msra.mxu0 %v822_v19 }
  0xc7   :  { %771 = vmatprep.subr.bf16.mxu0 %v1099_v0 }
  0xca   :  { %772 = vmatpush3.bf16.msra.mxu0 %v823_v20 }
  0xcb   :  { %773 = vmatprep.subr.bf16.mxu0 %v1099_v0 }
  0xce   :  { %774 = vmatpush3.bf16.msra.mxu0 %v824_v21 }
  0xcf   :  { %775 = vmatprep.subr.bf16.mxu0 %v1099_v0 }
  0xd2   :  { %776 = vmatpush3.bf16.msra.mxu0 %v825_v22 }
  0xd3   :  { %777 = vmatprep.subr.bf16.mxu0 %v1099_v0 }
  0xd6   :  { %778 = vmatpush3.bf16.msra.mxu0 %v826_v23 }
  0xd7   :  { %779 = vmatprep.subr.bf16.mxu0 %v1099_v0 }
  0xda   :  { %780 = vmatpush3.bf16.msra.mxu0 %v827_v24 }
  0xdb   :  { %781 = vmatprep.subr.bf16.mxu0 %v1099_v0 }
  0xde   :  { %782 = vmatpush3.bf16.msra.mxu0 %v828_v33 }
  0xdf   :  { %783 = vmatprep.subr.bf16.mxu0 %v1099_v0 }
  0xe2   :  { %784 = vmatpush3.bf16.msra.mxu0 %v829_v34 }
 0x198   :  { %v253_v26 = vpop.f32.mrb[0].mxu0 }
 0x199   :  { %v254_v27 = vadd.f32 %v659_v25, %v253_v26  ;;  %v747_v28 = vpop.f32.mrb[1].mxu0 }
 0x19a   :  { %v256_v29 = vpop.f32.mrb[2].mxu0 }
 0x19b   :  { %v259_v30 = vmax.f32 %v254_v27, 0.0  ;;  %v748_v31 = vpop.f32.mrb[3].mxu0 }
 0x19d   :  { %v260_v32 = vpack.c.bf16 %v259_v30, %v259_v30 }
 0x19f   :  { %766 = vmatmul.mubr.bf16.vlgmr.msra.gmra.mrb[0].mxu1 %v260_v32 }
 0x1a0   :  { %596 = vmatpush1.bf16.msra.mxu1 %v830_v35  ;;  %627 = vmatprep.mubr.bf16.mxu1 %v1101_v59 }
 0x1a1   :  { %597 = vmatprep.subr.bf16.mxu1 %v835_v37 }
 0x1a4   :  { %598 = vmatpush1.bf16.msra.mxu1 %v833_v38 }
 0x1a5   :  { %599 = vmatprep.subr.bf16.mxu1 %v838_v39 }
 0x1a8   :  { %600 = vmatpush1.bf16.msra.mxu1 %v836_v40 }
 0x1a9   :  { %601 = vmatprep.subr.bf16.mxu1 %v841_v41 }
 0x1ac   :  { %602 = vmatpush1.bf16.msra.mxu1 %v839_v42 }
 0x1ad   :  { %603 = vmatprep.subr.bf16.mxu1 %v844_v43 }
 0x1b0   :  { %604 = vmatpush1.bf16.msra.mxu1 %v842_v44 }
 0x1b1   :  { %605 = vmatprep.subr.bf16.mxu1 %v847_v45 }
 0x1b4   :  { %606 = vmatpush1.bf16.msra.mxu1 %v845_v46 }
 0x1b5   :  { %607 = vmatprep.subr.bf16.mxu1 %v850_v47 }
 0x1b8   :  { %608 = vmatpush1.bf16.msra.mxu1 %v848_v48 }
 0x1b9   :  { %609 = vmatprep.subr.bf16.mxu1 %v853_v57 }
 0x1bc   :  { %610 = vmatpush1.bf16.msra.mxu1 %v851_v58 }
 0x272   :  { %v366_v50 = vpop.f32.mrb[0].mxu1 }
 0x273   :  { %v367_v51 = vadd.f32 %v668_v49, %v366_v50  ;;  %v767_v52 = vpop.f32.mrb[1].mxu1 }
 0x274   :  { %v369_v53 = vpop.f32.mrb[2].mxu1 }
 0x275   :  { %v372_v54 = vmax.f32 %v367_v51, 0.0  ;;  %v768_v55 = vpop.f32.mrb[3].mxu1 }
 0x277   :  { %v373_v56 = vpack.c.bf16 %v372_v54, %v372_v54 }
 0x279   :  { %786 = vmatmul.mubr.bf16.vlgmr.msra.gmra.mrb[4].mxu0 %v373_v56 }
 0x34c   :  { %v479_v61 = vpop.f32.mrb[4].mxu0 }
 0x34d   :  { %v480_v62 = vadd.f32 %v677_v60, %v479_v61  ;;  %v787_v63 = vpop.f32.mrb[5].mxu0 }
 0x34e   :  { %v482_v0 = vpop.f32.mrb[6].mxu0 }
 0x34f   :  { %v485_v1 = vmax.f32 %v480_v62, 0.0  ;;  %v788_v2 = vpop.f32.mrb[7].mxu0 }
 0x351   :  { %v486_v3 = vpack.c.bf16 %v485_v1, %v485_v1 }
 0x353   :  { %628 = vmatmul.mubr.bf16.vlgmr.msra.gmra.mrb[4].mxu1 %v486_v3 }
 0x426   :  { %v629_v11 = vpop.f32.mrb[4].mxu1 }
 0x427   :  { %v630_v12 = vadd.f32 %v629_v11, %v508_v9  ;;  %v631_v13 = vpop.f32.mrb[5].mxu1 }
 0x428   :  { %v632_v14 = vadd.f32 %v631_v13, %v512_v10  ;;  %v633_v15 = vpop.f32.mrb[6].mxu1 }
 0x429   :  { %v636_v16 = vmax.f32 %v630_v12, 0.0  ;;  %v634_v17 = vpop.f32.mrb[7].mxu1 }
 0x42a   :  { %v637_v18 = vmax.f32 %v632_v14, 0.0 }
 0x42b   :  { %638 = vst [vmem:[#allocation17] sm:$0xff] %v636_v16 }
 0x42c   :  { %639 = vst [vmem:[#allocation17 + $0x8] sm:$0xff] %v637_v18 }
 0x42d   :  { %1063 = shalt.err (!%p1060_p6)
}
 0x42e   :  { %s1064_s7 = scalar_lea.hbm %s1321_s9, 256 }
 0x42f   :  { %p1065_p7 = scmp.ne.s32.totalorder %s1321_s9, %s1064_s7  ;;  %p1068_p8 = scmp.lt.u32.totalorder %s1064_s7, %s1321_s9 }
 0x431   :  { %p1070_p9 = pnand %p1068_p8, %p1065_p7 }
 0x433   :  { %1073 = shalt.err (!%p1070_p9)
}
 0x434   :  { %649 = dma.vmem_to_hbm [thread:$0]  %s647_s24, 256, %s1321_s9, [#allocation4]  }
 0x435   :  { %1084 = dma.done.wait [#allocation4], 256  }
 0x436   :  { %1085 = vsyncadd [#allocation4], 4294967040 }
 0x437   :  { %653 = vsyncpa [#allocation3], 1 }
 0x438   :  { %654 = vsyncpa [#allocation6], 1 }
 0x439   :  { %655 = vsyncpa [#allocation9], 1 }
 0x43a   :  { %656 = vsyncpa [#allocation12], 1 }
 0x43b   :  { %657 = vsyncpa [#allocation15], 1 }
 0x43c   :  { %658 = vsyncpa [#allocation4], 1 }

</bundles_post_ra>
